<compile_context>
chip_gen: v7x
topology: tpu7x:2x2x1
jax: 0.10.0
libtpu: 0.0.40
codegen_flags: <defaults>
</compile_context>

<pallas_src>
import functools

import jax
import jax.numpy as jnp
from jax import lax
from jax.experimental import pallas as pl
from jax.experimental.pallas import tpu as pltpu


def _resblock_kernel(x_ref, w1k_ref, b1_ref, w2_ref, b2_ref, w3_ref, b3_ref,
                     o_ref, xpad_ref, *, H, W, N, Cin, Cin_pad):
    # x_ref  : (N, Cin, L)        un-padded flattened spatial
    # w1k_ref: (Cmid, 9*Cin_pad)  conv3x3 weights, col = (dy*3+dx)*Cin_pad + c
    # b1_ref : (Cmid, 1)
    # w2_ref : (Cin, Cmid)        conv1x1 mid->in
    # b2_ref : (Cin, 1)
    # w3_ref : (Cout, Cin)        conv1x1 in->out (self.conv)
    # b3_ref : (Cout, 1)
    # o_ref  : (N*Cout, L)        batch stacked on sublanes
    # xpad_ref (scratch): (N, Cin_pad, Lpad)  zero-padded ReLU(x)
    L = H * W
    NL = N * L

    # Zero the padded scratch: provides the conv3x3 halo (via the flat-shift
    # trick) and the zero channels padding Cin -> Cin_pad.  ReLU(x) is written
    # at lane offset W+1 per image; all padding stays zero (ReLU(0) == 0).
    xpad_ref[...] = jnp.zeros_like(xpad_ref)
    for n in range(N):
        xpad_ref[n, :Cin, W + 1:W + 1 + L] = jnp.maximum(x_ref[n], 0.0)

    # Column-position masks: the flattened shift wraps across image rows at
    # the left/right border, where the true padded-conv value is 0.
    # (L is a multiple of W, so j % W is the in-image column for every lane.)
    col = lax.broadcasted_iota(jnp.int32, (1, NL), 1) % W
    not_left = col != 0                 # valid for dx == 0 taps
    not_right = col != (W - 1)          # valid for dx == 2 taps

    # im2col: 9 lane-shifted (Cin_pad, N*L) views (batch stacked on lanes),
    # taps concatenated on the sublane axis -> full 8-row aligned blocks.
    parts = []
    for dy in range(3):
        for dx in range(3):
            s = dy * W + dx
            p = jnp.concatenate(
                [xpad_ref[n, :, s:s + L] for n in range(N)], axis=-1)
            if dx == 0:
                p = jnp.where(not_left, p, 0.0)
            elif dx == 2:
                p = jnp.where(not_right, p, 0.0)
            parts.append(p)
    x_col = jnp.concatenate(parts, axis=0)          # (9*Cin_pad, N*L)

    # conv3x3 as a single MXU matmul (K = 9*Cin_pad), bias epilogue, ReLU.
    y = jnp.dot(w1k_ref[...], x_col, preferred_element_type=jnp.float32)
    y = jnp.maximum(y + b1_ref[...], 0.0)           # (Cmid, N*L)

    # 1x1 conv mid->in, residual add with the original (pre-ReLU) x.
    feat = jnp.dot(w2_ref[...], y,
                   preferred_element_type=jnp.float32) + b2_ref[...]
    x_res = jnp.concatenate([x_ref[n] for n in range(N)], axis=-1)  # (Cin, N*L)
    out = x_res + feat

    # Final 1x1 conv in->out.
    res = jnp.dot(w3_ref[...], out,
                  preferred_element_type=jnp.float32) + b3_ref[...]  # (Cout, N*L)

    # Re-stack batch on sublanes -> (N*Cout, L): full (8,128) f32 tiles,
    # unmasked lane- and sublane-dense store.
    o_ref[...] = jnp.concatenate(
        [res[:, n * L:(n + 1) * L] for n in range(N)], axis=0).astype(o_ref.dtype)


def resblock_pallas(x, w1, b1, w2, b2, w3, b3):
    """ResBlock forward.

    x : (N, Cin, H, W)           NCHW, as in PyTorch
    w1: (Cmid, Cin, 3, 3), b1: (Cmid,)        conv3x3 (pad=1)
    w2: (Cin, Cmid, 1, 1)  or (Cin, Cmid),  b2: (Cin,)
    w3: (Cout, Cin, 1, 1)  or (Cout, Cin),  b3: (Cout,)
    Returns (N, Cout, H, W).
    """
    N, Cin, H, W = x.shape
    Cmid = w1.shape[0]
    Cout = w3.shape[0]
    L = H * W
    Lpad = L + 2 * (W + 1)
    Cin_pad = ((Cin + 7) // 8) * 8      # im2col taps become full sublane blocks

    # Free contiguous reshape only; halo / channel padding happens in-kernel.
    x_flat = x.reshape(N, Cin, L)

    # Tiny one-time weight rearrangements (channel-major matmul layouts).
    # conv3x3: (Cmid, Cin, 3, 3) -> col = (dy*3+dx)*Cin_pad + c, zero-padded c.
    w1k = jnp.transpose(w1, (0, 2, 3, 1))
    w1k = jnp.pad(w1k, ((0, 0), (0, 0), (0, 0), (0, Cin_pad - Cin)))
    w1k = w1k.reshape(Cmid, 9 * Cin_pad)
    w2m = w2.reshape(Cin, Cmid)
    w3m = w3.reshape(Cout, Cin)
    b1c = b1.reshape(Cmid, 1)
    b2c = b2.reshape(Cin, 1)
    b3c = b3.reshape(Cout, 1)

    kernel = functools.partial(_resblock_kernel, H=H, W=W, N=N,
                               Cin=Cin, Cin_pad=Cin_pad)

    flops = 2 * N * L * (Cmid * 9 * Cin + Cin * Cmid + Cout * Cin)
    bytes_accessed = 4 * (N * Cin * L + N * Cout * L
                          + w1k.size + w2m.size + w3m.size
                          + Cmid + Cin + Cout)

    out_flat = pl.pallas_call(
        kernel,
        out_shape=jax.ShapeDtypeStruct((N * Cout, L), x.dtype),
        grid_spec=pltpu.PrefetchScalarGridSpec(
            num_scalar_prefetch=0,
            grid=(1,),                    # whole batch in one step (overhead-bound)
            in_specs=[
                pl.BlockSpec((N, Cin, L), lambda i: (0, 0, 0)),
                pl.BlockSpec((Cmid, 9 * Cin_pad), lambda i: (0, 0)),
                pl.BlockSpec((Cmid, 1), lambda i: (0, 0)),
                pl.BlockSpec((Cin, Cmid), lambda i: (0, 0)),
                pl.BlockSpec((Cin, 1), lambda i: (0, 0)),
                pl.BlockSpec((Cout, Cin), lambda i: (0, 0)),
                pl.BlockSpec((Cout, 1), lambda i: (0, 0)),
            ],
            out_specs=pl.BlockSpec((N * Cout, L), lambda i: (0, 0)),
            scratch_shapes=[pltpu.VMEM((N, Cin_pad, Lpad), jnp.float32)],
        ),
        compiler_params=pltpu.CompilerParams(
            dimension_semantics=("arbitrary",)),
        cost_estimate=pl.CostEstimate(
            flops=flops, transcendentals=0, bytes_accessed=bytes_accessed),
    )(x_flat, w1k, b1c, w2m, b2c, w3m, b3c)

    # Free contiguous view back to (N, Cout, H, W).
    return out_flat.reshape(N, Cout, H, W)


def resblock_reference(x, w1, b1, w2, b2, w3, b3):
    """Plain-JAX reference in native NCHW / OIHW (matches PyTorch)."""
    dn = ("NCHW", "OIHW", "NCHW")
    Cmid, Cin = w1.shape[0], w1.shape[1]
    Cout = w3.shape[0]
    w2_ = w2.reshape(Cin, Cmid, 1, 1)
    w3_ = w3.reshape(Cout, Cin, 1, 1)

    y = jax.nn.relu(x)
    y = lax.conv_general_dilated(y, w1, (1, 1), "SAME", dimension_numbers=dn)
    y = y + b1.reshape(1, -1, 1, 1)
    y = jax.nn.relu(y)
    feat = lax.conv_general_dilated(y, w2_, (1, 1), "VALID",
                                    dimension_numbers=dn)
    feat = feat + b2.reshape(1, -1, 1, 1)
    out = x + feat
    res = lax.conv_general_dilated(out, w3_, (1, 1), "VALID",
                                   dimension_numbers=dn)
    return res + b3.reshape(1, -1, 1, 1)


if __name__ == "__main__":
    N, Cin, H, W = 2, 4, 16, 16
    Cout = 4          # out_channels
    Cmid = Cout       # mid_channels defaults to out_channels

    key = jax.random.PRNGKey(0)
    kx, k1, k2, k3, k4, k5, k6 = jax.random.split(key, 7)

    x = jax.random.normal(kx, (N, Cin, H, W), jnp.float32)
    # Parameters in PyTorch-native layouts.
    w1 = jax.random.normal(k1, (Cmid, Cin, 3, 3), jnp.float32) * 0.1
    b1 = jax.random.normal(k2, (Cmid,), jnp.float32) * 0.1
    w2 = jax.random.normal(k3, (Cin, Cmid, 1, 1), jnp.float32) * 0.1
    b2 = jax.random.normal(k4, (Cin,), jnp.float32) * 0.1
    w3 = jax.random.normal(k5, (Cout, Cin, 1, 1), jnp.float32) * 0.1
    b3 = jax.random.normal(k6, (Cout,), jnp.float32) * 0.1

    y_kernel = jax.block_until_ready(
        resblock_pallas(x, w1, b1, w2, b2, w3, b3))
    y_ref = jax.block_until_ready(
        resblock_reference(x, w1, b1, w2, b2, w3, b3))

    assert y_kernel.shape == (N, Cout, H, W)
    assert jnp.allclose(y_kernel, y_ref, atol=1e-4, rtol=1e-4)
    print("KERNEL_OK")
</pallas_src>

<mosaic_0001>
module attributes {stable_mosaic.version = 11 : i64} {
  func.func @_resblock_kernel(%arg0: i32, %arg1: memref<2x4x256xf32, #tpu.memory_space<vmem>>, %arg2: memref<4x72xf32, #tpu.memory_space<vmem>>, %arg3: memref<4x1xf32, #tpu.memory_space<vmem>>, %arg4: memref<4x4xf32, #tpu.memory_space<vmem>>, %arg5: memref<4x1xf32, #tpu.memory_space<vmem>>, %arg6: memref<4x4xf32, #tpu.memory_space<vmem>>, %arg7: memref<4x1xf32, #tpu.memory_space<vmem>>, %arg8: memref<8x256xf32, #tpu.memory_space<vmem>>, %arg9: memref<2x8x290xf32, #tpu.memory_space<vmem>>) attributes {dimension_semantics = [#tpu.dimension_semantics<arbitrary>], iteration_bounds = array<i64: 1>, scalar_prefetch = 0 : i64, scratch_operands = 1 : i64, tpu.core_type = #tpu.core_type<tc>, window_params = [{pipeline_mode = #tpu.pipeline_mode<synchronous>, transform_indices = @transform_0, window_bounds = array<i64: 2, 4, 256>}, {pipeline_mode = #tpu.pipeline_mode<synchronous>, transform_indices = @transform_1, window_bounds = array<i64: 4, 72>}, {pipeline_mode = #tpu.pipeline_mode<synchronous>, transform_indices = @transform_2, window_bounds = array<i64: 4, 1>}, {pipeline_mode = #tpu.pipeline_mode<synchronous>, transform_indices = @transform_3, window_bounds = array<i64: 4, 4>}, {pipeline_mode = #tpu.pipeline_mode<synchronous>, transform_indices = @transform_4, window_bounds = array<i64: 4, 1>}, {pipeline_mode = #tpu.pipeline_mode<synchronous>, transform_indices = @transform_5, window_bounds = array<i64: 4, 4>}, {pipeline_mode = #tpu.pipeline_mode<synchronous>, transform_indices = @transform_6, window_bounds = array<i64: 4, 1>}, {pipeline_mode = #tpu.pipeline_mode<synchronous>, transform_indices = @transform_7, window_bounds = array<i64: 8, 256>}]} {
    %cst = arith.constant 0.000000e+00 : f32
    %0 = vector.broadcast %cst : f32 to vector<2x8x290xf32>
    %c0 = arith.constant 0 : index
    %c0_0 = arith.constant 0 : index
    %c0_1 = arith.constant 0 : index
    %1 = vector.load %arg9[%c0, %c0_0, %c0_1] : memref<2x8x290xf32, #tpu.memory_space<vmem>>, vector<2x8x290xf32>
    tpu.vector_store %arg9[%c0, %c0_0, %c0_1], %0 {strides = array<i32>} : memref<2x8x290xf32, #tpu.memory_space<vmem>>, vector<2x8x290xf32>,
    %c0_2 = arith.constant 0 : index
    %c0_3 = arith.constant 0 : index
    %c0_4 = arith.constant 0 : index
    %2 = vector.load %arg1[%c0_2, %c0_3, %c0_4] : memref<2x4x256xf32, #tpu.memory_space<vmem>>, vector<1x4x256xf32>
    %3 = vector.shape_cast %2 : vector<1x4x256xf32> to vector<4x256xf32>
    %cst_5 = arith.constant 0.000000e+00 : f32
    %4 = vector.broadcast %cst_5 : f32 to vector<4x256xf32>
    %5 = arith.maximumf %3, %4 : vector<4x256xf32>
    %c0_6 = arith.constant 0 : index
    %c0_7 = arith.constant 0 : index
    %c17 = arith.constant 17 : index
    %6 = vector.load %arg9[%c0_6, %c0_7, %c17] : memref<2x8x290xf32, #tpu.memory_space<vmem>>, vector<1x4x256xf32>
    %7 = vector.shape_cast %6 : vector<1x4x256xf32> to vector<4x256xf32>
    %8 = vector.shape_cast %5 : vector<4x256xf32> to vector<1x4x256xf32>
    tpu.vector_store %arg9[%c0_6, %c0_7, %c17], %8 {strides = array<i32>} : memref<2x8x290xf32, #tpu.memory_space<vmem>>, vector<1x4x256xf32>,
    %c1 = arith.constant 1 : index
    %c0_8 = arith.constant 0 : index
    %c0_9 = arith.constant 0 : index
    %9 = vector.load %arg1[%c1, %c0_8, %c0_9] : memref<2x4x256xf32, #tpu.memory_space<vmem>>, vector<1x4x256xf32>
    %10 = vector.shape_cast %9 : vector<1x4x256xf32> to vector<4x256xf32>
    %cst_10 = arith.constant 0.000000e+00 : f32
    %11 = vector.broadcast %cst_10 : f32 to vector<4x256xf32>
    %12 = arith.maximumf %10, %11 : vector<4x256xf32>
    %c1_11 = arith.constant 1 : index
    %c0_12 = arith.constant 0 : index
    %c17_13 = arith.constant 17 : index
    %13 = vector.load %arg9[%c1_11, %c0_12, %c17_13] : memref<2x8x290xf32, #tpu.memory_space<vmem>>, vector<1x4x256xf32>
    %14 = vector.shape_cast %13 : vector<1x4x256xf32> to vector<4x256xf32>
    %15 = vector.shape_cast %12 : vector<4x256xf32> to vector<1x4x256xf32>
    tpu.vector_store %arg9[%c1_11, %c0_12, %c17_13], %15 {strides = array<i32>} : memref<2x8x290xf32, #tpu.memory_space<vmem>>, vector<1x4x256xf32>,
    %16 = tpu.iota {dimensions = array<i32: 1>} : vector<1x512xi32>
    %c16_i32 = arith.constant 16 : i32
    %c0_i32 = arith.constant 0 : i32
    %17 = arith.cmpi eq, %c16_i32, %c0_i32 : i32
    %c1_i32 = arith.constant 1 : i32
    %18 = arith.select %17, %c1_i32, %c16_i32 : i32
    %19 = vector.broadcast %18 : i32 to vector<1x512xi32>
    %20 = arith.remsi %16, %19 : vector<1x512xi32>
    %c0_i32_14 = arith.constant 0 : i32
    %21 = vector.broadcast %c0_i32_14 : i32 to vector<1x512xi32>
    %22 = arith.cmpi ne, %20, %21 : vector<1x512xi32>
    %c0_i32_15 = arith.constant 0 : i32
    %23 = vector.broadcast %c0_i32_15 : i32 to vector<1x512xi32>
    %24 = arith.cmpi slt, %20, %23 : vector<1x512xi32>
    %c0_i32_16 = arith.constant 0 : i32
    %25 = arith.cmpi slt, %18, %c0_i32_16 : i32
    %26 = vector.broadcast %25 : i1 to vector<1x512xi1>
    %27 = vector.broadcast %26 : vector<1x512xi1> to vector<1x512xi1>
    %28 = arith.xori %24, %27 : vector<1x512xi1>
    %29 = arith.andi %28, %22 : vector<1x512xi1>
    %30 = vector.broadcast %18 : i32 to vector<1x512xi32>
    %31 = arith.addi %20, %30 : vector<1x512xi32>
    %32 = arith.select %29, %31, %20 : vector<1x512xi1>, vector<1x512xi32>
    %c0_i32_17 = arith.constant 0 : i32
    %33 = vector.broadcast %c0_i32_17 : i32 to vector<1x512xi32>
    %34 = arith.cmpi ne, %32, %33 : vector<1x512xi32>
    %c15_i32 = arith.constant 15 : i32
    %35 = vector.broadcast %c15_i32 : i32 to vector<1x512xi32>
    %36 = arith.cmpi ne, %32, %35 : vector<1x512xi32>
    %c0_18 = arith.constant 0 : index
    %c0_19 = arith.constant 0 : index
    %c0_20 = arith.constant 0 : index
    %37 = vector.load %arg9[%c0_18, %c0_19, %c0_20] : memref<2x8x290xf32, #tpu.memory_space<vmem>>, vector<1x8x256xf32>
    %38 = vector.shape_cast %37 : vector<1x8x256xf32> to vector<8x256xf32>
    %c1_21 = arith.constant 1 : index
    %c0_22 = arith.constant 0 : index
    %c0_23 = arith.constant 0 : index
    %39 = vector.load %arg9[%c1_21, %c0_22, %c0_23] : memref<2x8x290xf32, #tpu.memory_space<vmem>>, vector<1x8x256xf32>
    %40 = vector.shape_cast %39 : vector<1x8x256xf32> to vector<8x256xf32>
    %41 = tpu.concatenate %38, %40 in 1 : vector<8x256xf32>, vector<8x256xf32> -> vector<8x512xf32>
    %cst_24 = arith.constant 0.000000e+00 : f32
    %42 = vector.shape_cast %34 : vector<1x512xi1> to vector<1x512xi1>
    %43 = vector.broadcast %42 : vector<1x512xi1> to vector<8x512xi1>
    %44 = vector.broadcast %cst_24 : f32 to vector<8x512xf32>
    %45 = arith.select %43, %41, %44 : vector<8x512xi1>, vector<8x512xf32>
    %c0_25 = arith.constant 0 : index
    %c0_26 = arith.constant 0 : index
    %c1_27 = arith.constant 1 : index
    %46 = vector.load %arg9[%c0_25, %c0_26, %c1_27] : memref<2x8x290xf32, #tpu.memory_space<vmem>>, vector<1x8x256xf32>
    %47 = vector.shape_cast %46 : vector<1x8x256xf32> to vector<8x256xf32>
    %c1_28 = arith.constant 1 : index
    %c0_29 = arith.constant 0 : index
    %c1_30 = arith.constant 1 : index
    %48 = vector.load %arg9[%c1_28, %c0_29, %c1_30] : memref<2x8x290xf32, #tpu.memory_space<vmem>>, vector<1x8x256xf32>
    %49 = vector.shape_cast %48 : vector<1x8x256xf32> to vector<8x256xf32>
    %50 = tpu.concatenate %47, %49 in 1 : vector<8x256xf32>, vector<8x256xf32> -> vector<8x512xf32>
    %c0_31 = arith.constant 0 : index
    %c0_32 = arith.constant 0 : index
    %c2 = arith.constant 2 : index
    %51 = vector.load %arg9[%c0_31, %c0_32, %c2] : memref<2x8x290xf32, #tpu.memory_space<vmem>>, vector<1x8x256xf32>
    %52 = vector.shape_cast %51 : vector<1x8x256xf32> to vector<8x256xf32>
    %c1_33 = arith.constant 1 : index
    %c0_34 = arith.constant 0 : index
    %c2_35 = arith.constant 2 : index
    %53 = vector.load %arg9[%c1_33, %c0_34, %c2_35] : memref<2x8x290xf32, #tpu.memory_space<vmem>>, vector<1x8x256xf32>
    %54 = vector.shape_cast %53 : vector<1x8x256xf32> to vector<8x256xf32>
    %55 = tpu.concatenate %52, %54 in 1 : vector<8x256xf32>, vector<8x256xf32> -> vector<8x512xf32>
    %cst_36 = arith.constant 0.000000e+00 : f32
    %56 = vector.shape_cast %36 : vector<1x512xi1> to vector<1x512xi1>
    %57 = vector.broadcast %56 : vector<1x512xi1> to vector<8x512xi1>
    %58 = vector.broadcast %cst_36 : f32 to vector<8x512xf32>
    %59 = arith.select %57, %55, %58 : vector<8x512xi1>, vector<8x512xf32>
    %c0_37 = arith.constant 0 : index
    %c0_38 = arith.constant 0 : index
    %c16 = arith.constant 16 : index
    %60 = vector.load %arg9[%c0_37, %c0_38, %c16] : memref<2x8x290xf32, #tpu.memory_space<vmem>>, vector<1x8x256xf32>
    %61 = vector.shape_cast %60 : vector<1x8x256xf32> to vector<8x256xf32>
    %c1_39 = arith.constant 1 : index
    %c0_40 = arith.constant 0 : index
    %c16_41 = arith.constant 16 : index
    %62 = vector.load %arg9[%c1_39, %c0_40, %c16_41] : memref<2x8x290xf32, #tpu.memory_space<vmem>>, vector<1x8x256xf32>
    %63 = vector.shape_cast %62 : vector<1x8x256xf32> to vector<8x256xf32>
    %64 = tpu.concatenate %61, %63 in 1 : vector<8x256xf32>, vector<8x256xf32> -> vector<8x512xf32>
    %cst_42 = arith.constant 0.000000e+00 : f32
    %65 = vector.shape_cast %34 : vector<1x512xi1> to vector<1x512xi1>
    %66 = vector.broadcast %65 : vector<1x512xi1> to vector<8x512xi1>
    %67 = vector.broadcast %cst_42 : f32 to vector<8x512xf32>
    %68 = arith.select %66, %64, %67 : vector<8x512xi1>, vector<8x512xf32>
    %c0_43 = arith.constant 0 : index
    %c0_44 = arith.constant 0 : index
    %c17_45 = arith.constant 17 : index
    %69 = vector.load %arg9[%c0_43, %c0_44, %c17_45] : memref<2x8x290xf32, #tpu.memory_space<vmem>>, vector<1x8x256xf32>
    %70 = vector.shape_cast %69 : vector<1x8x256xf32> to vector<8x256xf32>
    %c1_46 = arith.constant 1 : index
    %c0_47 = arith.constant 0 : index
    %c17_48 = arith.constant 17 : index
    %71 = vector.load %arg9[%c1_46, %c0_47, %c17_48] : memref<2x8x290xf32, #tpu.memory_space<vmem>>, vector<1x8x256xf32>
    %72 = vector.shape_cast %71 : vector<1x8x256xf32> to vector<8x256xf32>
    %73 = tpu.concatenate %70, %72 in 1 : vector<8x256xf32>, vector<8x256xf32> -> vector<8x512xf32>
    %c0_49 = arith.constant 0 : index
    %c0_50 = arith.constant 0 : index
    %c18 = arith.constant 18 : index
    %74 = vector.load %arg9[%c0_49, %c0_50, %c18] : memref<2x8x290xf32, #tpu.memory_space<vmem>>, vector<1x8x256xf32>
    %75 = vector.shape_cast %74 : vector<1x8x256xf32> to vector<8x256xf32>
    %c1_51 = arith.constant 1 : index
    %c0_52 = arith.constant 0 : index
    %c18_53 = arith.constant 18 : index
    %76 = vector.load %arg9[%c1_51, %c0_52, %c18_53] : memref<2x8x290xf32, #tpu.memory_space<vmem>>, vector<1x8x256xf32>
    %77 = vector.shape_cast %76 : vector<1x8x256xf32> to vector<8x256xf32>
    %78 = tpu.concatenate %75, %77 in 1 : vector<8x256xf32>, vector<8x256xf32> -> vector<8x512xf32>
    %cst_54 = arith.constant 0.000000e+00 : f32
    %79 = vector.shape_cast %36 : vector<1x512xi1> to vector<1x512xi1>
    %80 = vector.broadcast %79 : vector<1x512xi1> to vector<8x512xi1>
    %81 = vector.broadcast %cst_54 : f32 to vector<8x512xf32>
    %82 = arith.select %80, %78, %81 : vector<8x512xi1>, vector<8x512xf32>
    %c0_55 = arith.constant 0 : index
    %c0_56 = arith.constant 0 : index
    %c32 = arith.constant 32 : index
    %83 = vector.load %arg9[%c0_55, %c0_56, %c32] : memref<2x8x290xf32, #tpu.memory_space<vmem>>, vector<1x8x256xf32>
    %84 = vector.shape_cast %83 : vector<1x8x256xf32> to vector<8x256xf32>
    %c1_57 = arith.constant 1 : index
    %c0_58 = arith.constant 0 : index
    %c32_59 = arith.constant 32 : index
    %85 = vector.load %arg9[%c1_57, %c0_58, %c32_59] : memref<2x8x290xf32, #tpu.memory_space<vmem>>, vector<1x8x256xf32>
    %86 = vector.shape_cast %85 : vector<1x8x256xf32> to vector<8x256xf32>
    %87 = tpu.concatenate %84, %86 in 1 : vector<8x256xf32>, vector<8x256xf32> -> vector<8x512xf32>
    %cst_60 = arith.constant 0.000000e+00 : f32
    %88 = vector.shape_cast %34 : vector<1x512xi1> to vector<1x512xi1>
    %89 = vector.broadcast %88 : vector<1x512xi1> to vector<8x512xi1>
    %90 = vector.broadcast %cst_60 : f32 to vector<8x512xf32>
    %91 = arith.select %89, %87, %90 : vector<8x512xi1>, vector<8x512xf32>
    %c0_61 = arith.constant 0 : index
    %c0_62 = arith.constant 0 : index
    %c33 = arith.constant 33 : index
    %92 = vector.load %arg9[%c0_61, %c0_62, %c33] : memref<2x8x290xf32, #tpu.memory_space<vmem>>, vector<1x8x256xf32>
    %93 = vector.shape_cast %92 : vector<1x8x256xf32> to vector<8x256xf32>
    %c1_63 = arith.constant 1 : index
    %c0_64 = arith.constant 0 : index
    %c33_65 = arith.constant 33 : index
    %94 = vector.load %arg9[%c1_63, %c0_64, %c33_65] : memref<2x8x290xf32, #tpu.memory_space<vmem>>, vector<1x8x256xf32>
    %95 = vector.shape_cast %94 : vector<1x8x256xf32> to vector<8x256xf32>
    %96 = tpu.concatenate %93, %95 in 1 : vector<8x256xf32>, vector<8x256xf32> -> vector<8x512xf32>
    %c0_66 = arith.constant 0 : index
    %c0_67 = arith.constant 0 : index
    %c34 = arith.constant 34 : index
    %97 = vector.load %arg9[%c0_66, %c0_67, %c34] : memref<2x8x290xf32, #tpu.memory_space<vmem>>, vector<1x8x256xf32>
    %98 = vector.shape_cast %97 : vector<1x8x256xf32> to vector<8x256xf32>
    %c1_68 = arith.constant 1 : index
    %c0_69 = arith.constant 0 : index
    %c34_70 = arith.constant 34 : index
    %99 = vector.load %arg9[%c1_68, %c0_69, %c34_70] : memref<2x8x290xf32, #tpu.memory_space<vmem>>, vector<1x8x256xf32>
    %100 = vector.shape_cast %99 : vector<1x8x256xf32> to vector<8x256xf32>
    %101 = tpu.concatenate %98, %100 in 1 : vector<8x256xf32>, vector<8x256xf32> -> vector<8x512xf32>
    %cst_71 = arith.constant 0.000000e+00 : f32
    %102 = vector.shape_cast %36 : vector<1x512xi1> to vector<1x512xi1>
    %103 = vector.broadcast %102 : vector<1x512xi1> to vector<8x512xi1>
    %104 = vector.broadcast %cst_71 : f32 to vector<8x512xf32>
    %105 = arith.select %103, %101, %104 : vector<8x512xi1>, vector<8x512xf32>
    %106 = tpu.concatenate %45, %50, %59, %68, %73, %82, %91, %96, %105 in 0 : vector<8x512xf32>, vector<8x512xf32>, vector<8x512xf32>, vector<8x512xf32>, vector<8x512xf32>, vector<8x512xf32>, vector<8x512xf32>, vector<8x512xf32>, vector<8x512xf32> -> vector<72x512xf32>
    %c0_72 = arith.constant 0 : index
    %c0_73 = arith.constant 0 : index
    %107 = vector.load %arg2[%c0_72, %c0_73] : memref<4x72xf32, #tpu.memory_space<vmem>>, vector<4x72xf32>
    %cst_74 = arith.constant dense<0.000000e+00> : vector<4x512xf32>
    %108 = tpu.matmul %107, %106, %cst_74 {dimension_numbers = #tpu.dot_dimension_numbers<[1], [0], [0], [1], [0, 0, 1, 1], [], []>} : vector<4x72xf32>, vector<72x512xf32>, vector<4x512xf32> -> vector<4x512xf32>
    %c0_75 = arith.constant 0 : index
    %c0_76 = arith.constant 0 : index
    %109 = vector.load %arg3[%c0_75, %c0_76] : memref<4x1xf32, #tpu.memory_space<vmem>>, vector<4x1xf32>
    %110 = vector.broadcast %109 : vector<4x1xf32> to vector<4x512xf32>
    %111 = arith.addf %108, %110 : vector<4x512xf32>
    %cst_77 = arith.constant 0.000000e+00 : f32
    %112 = vector.broadcast %cst_77 : f32 to vector<4x512xf32>
    %113 = arith.maximumf %111, %112 : vector<4x512xf32>
    %c0_78 = arith.constant 0 : index
    %c0_79 = arith.constant 0 : index
    %114 = vector.load %arg4[%c0_78, %c0_79] : memref<4x4xf32, #tpu.memory_space<vmem>>, vector<4x4xf32>
    %cst_80 = arith.constant dense<0.000000e+00> : vector<4x512xf32>
    %115 = tpu.matmul %114, %113, %cst_80 {dimension_numbers = #tpu.dot_dimension_numbers<[1], [0], [0], [1], [0, 0, 1, 1], [], []>} : vector<4x4xf32>, vector<4x512xf32>, vector<4x512xf32> -> vector<4x512xf32>
    %c0_81 = arith.constant 0 : index
    %c0_82 = arith.constant 0 : index
    %116 = vector.load %arg5[%c0_81, %c0_82] : memref<4x1xf32, #tpu.memory_space<vmem>>, vector<4x1xf32>
    %117 = vector.broadcast %116 : vector<4x1xf32> to vector<4x512xf32>
    %118 = arith.addf %115, %117 : vector<4x512xf32>
    %c0_83 = arith.constant 0 : index
    %c0_84 = arith.constant 0 : index
    %c0_85 = arith.constant 0 : index
    %119 = vector.load %arg1[%c0_83, %c0_84, %c0_85] : memref<2x4x256xf32, #tpu.memory_space<vmem>>, vector<1x4x256xf32>
    %120 = vector.shape_cast %119 : vector<1x4x256xf32> to vector<4x256xf32>
    %c1_86 = arith.constant 1 : index
    %c0_87 = arith.constant 0 : index
    %c0_88 = arith.constant 0 : index
    %121 = vector.load %arg1[%c1_86, %c0_87, %c0_88] : memref<2x4x256xf32, #tpu.memory_space<vmem>>, vector<1x4x256xf32>
    %122 = vector.shape_cast %121 : vector<1x4x256xf32> to vector<4x256xf32>
    %123 = tpu.concatenate %120, %122 in 1 : vector<4x256xf32>, vector<4x256xf32> -> vector<4x512xf32>
    %124 = arith.addf %123, %118 : vector<4x512xf32>
    %c0_89 = arith.constant 0 : index
    %c0_90 = arith.constant 0 : index
    %125 = vector.load %arg6[%c0_89, %c0_90] : memref<4x4xf32, #tpu.memory_space<vmem>>, vector<4x4xf32>
    %cst_91 = arith.constant dense<0.000000e+00> : vector<4x512xf32>
    %126 = tpu.matmul %125, %124, %cst_91 {dimension_numbers = #tpu.dot_dimension_numbers<[1], [0], [0], [1], [0, 0, 1, 1], [], []>} : vector<4x4xf32>, vector<4x512xf32>, vector<4x512xf32> -> vector<4x512xf32>
    %c0_92 = arith.constant 0 : index
    %c0_93 = arith.constant 0 : index
    %127 = vector.load %arg7[%c0_92, %c0_93] : memref<4x1xf32, #tpu.memory_space<vmem>>, vector<4x1xf32>
    %128 = vector.broadcast %127 : vector<4x1xf32> to vector<4x512xf32>
    %129 = arith.addf %126, %128 : vector<4x512xf32>
    %130 = vector.extract_strided_slice %129 {offsets = [0, 0], sizes = [4, 256], strides = [1, 1]} : vector<4x512xf32> to vector<4x256xf32>
    %131 = vector.extract_strided_slice %129 {offsets = [0, 256], sizes = [4, 256], strides = [1, 1]} : vector<4x512xf32> to vector<4x256xf32>
    %132 = tpu.concatenate %130, %131 in 0 : vector<4x256xf32>, vector<4x256xf32> -> vector<8x256xf32>
    %c0_94 = arith.constant 0 : index
    %c0_95 = arith.constant 0 : index
    %133 = vector.load %arg8[%c0_94, %c0_95] : memref<8x256xf32, #tpu.memory_space<vmem>>, vector<8x256xf32>
    tpu.vector_store %arg8[%c0_94, %c0_95], %132 {strides = array<i32>} : memref<8x256xf32, #tpu.memory_space<vmem>>, vector<8x256xf32>,
    return
  }
  func.func @transform_0(%arg0: i32) -> (i32, i32, i32) {
    %c0_i32 = arith.constant 0 : i32
    %c0_i32_0 = arith.constant 0 : i32
    %c0_i32_1 = arith.constant 0 : i32
    %c0_i32_2 = arith.constant 0 : i32
    return %c0_i32, %c0_i32_0, %c0_i32_1 : i32, i32, i32
  }
  func.func @transform_1(%arg0: i32) -> (i32, i32) {
    %c0_i32 = arith.constant 0 : i32
    %c0_i32_0 = arith.constant 0 : i32
    %c0_i32_1 = arith.constant 0 : i32
    return %c0_i32, %c0_i32_0 : i32, i32
  }
  func.func @transform_2(%arg0: i32) -> (i32, i32) {
    %c0_i32 = arith.constant 0 : i32
    %c0_i32_0 = arith.constant 0 : i32
    %c0_i32_1 = arith.constant 0 : i32
    return %c0_i32, %c0_i32_0 : i32, i32
  }
  func.func @transform_3(%arg0: i32) -> (i32, i32) {
    %c0_i32 = arith.constant 0 : i32
    %c0_i32_0 = arith.constant 0 : i32
    %c0_i32_1 = arith.constant 0 : i32
    return %c0_i32, %c0_i32_0 : i32, i32
  }
  func.func @transform_4(%arg0: i32) -> (i32, i32) {
    %c0_i32 = arith.constant 0 : i32
    %c0_i32_0 = arith.constant 0 : i32
    %c0_i32_1 = arith.constant 0 : i32
    return %c0_i32, %c0_i32_0 : i32, i32
  }
  func.func @transform_5(%arg0: i32) -> (i32, i32) {
    %c0_i32 = arith.constant 0 : i32
    %c0_i32_0 = arith.constant 0 : i32
    %c0_i32_1 = arith.constant 0 : i32
    return %c0_i32, %c0_i32_0 : i32, i32
  }
  func.func @transform_6(%arg0: i32) -> (i32, i32) {
    %c0_i32 = arith.constant 0 : i32
    %c0_i32_0 = arith.constant 0 : i32
    %c0_i32_1 = arith.constant 0 : i32
    return %c0_i32, %c0_i32_0 : i32, i32
  }
  func.func @transform_7(%arg0: i32) -> (i32, i32) {
    %c0_i32 = arith.constant 0 : i32
    %c0_i32_0 = arith.constant 0 : i32
    %c0_i32_1 = arith.constant 0 : i32
    return %c0_i32, %c0_i32_0 : i32, i32
  }
}

</mosaic_0001>

<bundles_post_ra>
// kernel: tpu_custom_call.1
= control target key start
LH: loop header
LB: loop body
LE: loop exit
PB: predicated region body
PF: predicated region fallthrough
CT: control target
= control target key end

     0   :  { %12 = vsyncpa [#allocation4], 0  ;;  %s1510_s0 = inlined_call_operand.hbm [shape: f32[2,4,256], index: 0, kind: input, shape index: {}]   ;;  %s1511_s1 = inlined_call_operand.vmem [shape: f32[4,72], index: 1, kind: input, shape index: {}]   ;;  %s1512_s2 = inlined_call_operand.vmem [shape: f32[4,1], index: 2, kind: input, shape index: {}]   ;;  %s1513_s3 = inlined_call_operand.vmem [shape: f32[4,4], index: 3, kind: input, shape index: {}]   ;;  %s1514_s4 = inlined_call_operand.vmem [shape: f32[4,1], index: 4, kind: input, shape index: {}]   ;;  %s1515_s5 = inlined_call_operand.vmem [shape: f32[4,4], index: 5, kind: input, shape index: {}]   ;;  %s1516_s6 = inlined_call_operand.vmem [shape: f32[4,1], index: 6, kind: input, shape index: {}]   ;;  %s1517_s7 = inlined_call_operand.hbm [shape: f32[8,256], index: 7, kind: output, shape index: {}]  }
   0x1   :  { %13 = vsyncpa [#allocation5], 0  ;;  %s1145_s24 = smov [#allocation3]   ;;  %s1097_s28 = scalar_lea.hbm %s1510_s0, 256 }
   0x2   :  { %s19_s25 = sshll.u32 %s1145_s24, 4  ;;  %p1098_p0 = scmp.ne.s32.totalorder %s1510_s0, %s1097_s28  ;;  %s20_s25 = int_to_ptr.vmem [resolvable:$true] %s19_s25 }
   0x3   :  { %p1101_p1 = scmp.lt.u32.totalorder %s1097_s28, %s1510_s0 }
   0x5   :  { %p1103_p2 = pnand %p1101_p1, %p1098_p0 }
   0x7   :  { %1106 = shalt.err (!%p1103_p2)
}
   0x8   :  { %s1107_s10 = scalar_lea.vmem %s20_s25, 256  ;;  %p1112_p4 = scmp.lt.s32.totalorder %s20_s25, %s20_s25 }
   0x9   :  { %p1108_p3 = scmp.ne.s32.totalorder %s20_s25, %s1107_s10  ;;  %p1113_p5 = scmp.lt.s32.totalorder %s1107_s10, %s1107_s10 }
   0xb   :  { %p1114_p6 = por %p1113_p5, %p1112_p4 }
   0xd   :  { %p1115_p7 = pnand %p1114_p6, %p1108_p3 }
   0xf   :  { %1118 = shalt.err (!%p1115_p7)
}
  0x10   :  { %s1146_s11 = smov 128   ;;  %s1147_s12 = smov 8  }
  0x11   :  { %25 = dma.hbm_to_vmem [thread:$0]  %s1510_s0, 256, %s20_s25, [#allocation4], %s1146_s11, %s1146_s11, %s1147_s12  }
  0x12   :  { %1141 = dma.done.wait [#allocation4], 256  }
  0x13   :  { %1142 = vsyncadd [#allocation4], 4294967040  ;;  %vm43_vm0 = vcmask 277504   ;;  %v1148_v0 = vmov 0.0   ;;  %v1221_v1 = vld [vmem:[#allocation3] sm:$0xff]  ;;  %v1223_v2 = vld [vmem:[#allocation3 + $0x8] sm:$0xff]  ;;  %v83_v26 = vlaneseq }
  0x14   :  { %41 = vst [vmem:[#allocation2] sm:$0xff] %v1148_v0  ;;  %42 = vst [vmem:[#allocation2 + $0x8] sm:$0xff] %v1148_v0  ;;  %510 = vmatprep.mubr.f32.mxu1 %v1148_v0  ;;  %439 = vmatprep.mubr.f32.mxu0 %v1148_v0  ;;  %v49_v3 = vmax.f32 %v1221_v1, 0.0  ;;  %v68_v4 = vmax.f32 %v1223_v2, 0.0  ;;  %s1149_s0 = smov 17   ;;  %vm61_vm1 = vcmask 1043592  }
  0x15   :  { %45 = vst [vmem:[#allocation2 + $0x18] sm:$0xff] %v1148_v0  ;;  %46 = vst [vmem:[#allocation2 + $0x20] sm:$0xff] %v1148_v0  ;;  %vm56_vm2 = vcmask 138240   ;;  %vm64_vm3 = vcmask 134144   ;;  %s1150_s15 = smov 94   ;;  %s1151_s16 = smov 126  }
  0x16   :  { %44 = vst.msk [vmem:[#allocation2 + $0x10] sm:$0xff] %vm43_vm0, %v1148_v0  ;;  %47 = vst.msk [vmem:[#allocation2 + $0x28] sm:$0xff] %vm43_vm0, %v1148_v0  ;;  %52 = vrot.lane.b32.xlu1 %v49_v3, %s1149_s0  ;;  %v51_v5 = vcombine.high %v49_v3, %v49_v3  ;;  %71 = vrot.lane.b32.xlu0 %v68_v4, %s1149_s0  ;;  %v70_v6 = vcombine.high %v68_v4, %v68_v4  ;;  %s1152_s17 = smov 127   ;;  %s1153_s18 = smov 111   ;;  %v1158_v22 = vmov 0   ;;  %v1259_v29 = vand.u32 127, %v83_v26 }
  0x17   :  { %s1154_s19 = smov 112   ;;  %s1155_s20 = smov 96   ;;  %1095 = vset.pattern.permute.xlu1 %v1158_v22  ;;  %1096 = vset.pattern.permute.xlu0 %v1158_v22  ;;  %v365_v23 = vld [vmem:[%s1512_s2] sm:$0xf]  ;;  %vm171_vm5 = vcmask 1039360   ;;  %vm1518_vm7 = vmmov 1  }
  0x18   :  { %s1156_s21 = smov 110   ;;  %s1157_s22 = smov 95   ;;  %v700_v24 = vld [vmem:[%s1516_s6] sm:$0xf]  ;;  %v85_v32 = vadd.s32 128, %v1259_v29  ;;  %v92_v36 = vand.u32 15, %v1259_v29 }
  0x19   :  { %v87_v40 = vadd.s32 384, %v1259_v29  ;;  %v86_v45 = vadd.s32 256, %v1259_v29  ;;  %vm195_vm12 = vcmask 1031168   ;;  %vm228_vm14 = vcmask 916480   ;;  %v364_v47 = vld [vmem:[%s1511_s1] sm:$0xf] }
  0x1a   :  { %54 = vrot.lane.b32.xlu1 %v51_v5, %s1149_s0  ;;  %73 = vrot.lane.b32.xlu0 %v70_v6, %s1149_s0  ;;  %v99_v35 = vand.u32 15, %v85_v32  ;;  %vm1280_vm6 = vcmp.ne.s32.totalorder %v92_v36, 0  ;;  %v522_v53 = vld [vmem:[%s1514_s4] sm:$0xf] }
  0x1b   :  { %vm1301_vm9 = vmpackc.low %vm1518_vm7, %vm1280_vm6  ;;  %v113_v54 = vand.u32 15, %v87_v40  ;;  %v106_v55 = vand.u32 15, %v86_v45 }
  0x1c   :  { %vm1273_vm4 = vcmp.ne.s32.totalorder %v99_v35, 0 }
  0x1d   :  { %vm1289_vm8 = vmpackc.low %vm1518_vm7, %vm1273_vm4  ;;  %vm1309_vm10 = vcmp.ne.s32.totalorder %v113_v54, 0  ;;  %vm1313_vm11 = vcmp.ne.s32.totalorder %v106_v55, 0  ;;  %vm1327_vm15 = vcmp.ne.s32.totalorder %v113_v54, 15 }
  0x1e   :  { %vm1321_vm13 = vmpackc.low %vm1518_vm7, %vm1309_vm10 }
  0x1f   :  { %vm1336_vm0 = vmpackc.low %vm1518_vm7, %vm1313_vm11  ;;  %vm274_vm7 = vcmask 900096  }
  0x88   :  { %v53_v7 = vpop.permute.xlu1 %52  ;;  %v72_v8 = vpop.permute.xlu0 %71 }
  0x89   :  { %62 = vst.msk [vmem:[#allocation2] sm:$0xf] %vm61_vm1, %v53_v7  ;;  %80 = vst.msk [vmem:[#allocation2 + $0x18] sm:$0xf] %vm61_vm1, %v72_v8 }
  0x8a   :  { %vm957_vm1 = vmpackc.low %vm1309_vm10, %vm1327_vm15 }
  0x8c   :  { %v55_v9 = vpop.permute.xlu1 %54  ;;  %v74_v10 = vpop.permute.xlu0 %73 }
  0x8d   :  { %v57_v11 = vsel %vm56_vm2, %v53_v7, %v55_v9  ;;  %65 = vst.msk [vmem:[#allocation2 + $0x10] sm:$0xf] %vm64_vm3, %v55_v9  ;;  %v75_v12 = vsel %vm56_vm2, %v72_v8, %v74_v10  ;;  %82 = vst.msk [vmem:[#allocation2 + $0x28] sm:$0xf] %vm64_vm3, %v74_v10  ;;  %vm1350_vm2 = vcmp.ne.s32.totalorder %v99_v35, 15  ;;  %vm1356_vm3 = vcmp.ne.s32.totalorder %v106_v55, 15 }
  0x8e   :  { %63 = vst [vmem:[#allocation2 + $0x8] sm:$0xf] %v57_v11  ;;  %81 = vst [vmem:[#allocation2 + $0x20] sm:$0xf] %v75_v12 }
  0x90   :  { %v1227_v13 = vld [vmem:[#allocation2 + $0x18] sm:$0xff]  ;;  %v1231_v14 = vld [vmem:[#allocation2] sm:$0xff] }
  0x91   :  { %350 = vrot.lane.b32.xlu1 %v1227_v13, %s1150_s15 }
  0x94   :  { %v160_v15 = vld [vmem:[#allocation2 + $0x10] sm:$0xff]  ;;  %v161_v20 = vld [vmem:[#allocation2 + $0x28] sm:$0xff] }
  0x95   :  { %v995_v16 = vpack.i.bf16 %v1231_v14, %v160_v15  ;;  %v1234_v17 = vld [vmem:[#allocation2 + $0x8] sm:$0xff]  ;;  %v1238_v19 = vld [vmem:[#allocation2 + $0x20] sm:$0xff] }
  0x96   :  { %v1030_v18 = vpack.i.bf16 %v1234_v17, %v1227_v13  ;;  %v1035_v21 = vpack.i.bf16 %v161_v20, %v1238_v19 }
  0x97   :  { %996 = vrot.lane.b32.xlu1 %v995_v16, %s1151_s16  ;;  %991 = vrot.lane.b32.xlu0 %v995_v16, %s1152_s17 }
  0x9b   :  { %1006 = vrot.lane.b32.xlu1 %v995_v16, %s1153_s18  ;;  %1001 = vrot.lane.b32.xlu0 %v995_v16, %s1154_s19 }
  0x9f   :  { %1016 = vrot.lane.b32.xlu1 %v995_v16, %s1155_s20  ;;  %1011 = vrot.lane.b32.xlu0 %v995_v16, %s1156_s21 }
  0xa3   :  { %1031 = vrot.lane.b32.xlu1 %v1030_v18, %s1152_s17  ;;  %1021 = vrot.lane.b32.xlu0 %v995_v16, %s1157_s22 }
  0xa7   :  { %1036 = vrot.lane.b32.xlu1 %v1035_v21, %s1151_s16  ;;  %354 = vrot.lane.b32.xlu0 %v161_v20, %s1150_s15 }
  0xab   :  { %1046 = vrot.lane.b32.xlu1 %v1030_v18, %s1151_s16  ;;  %1026 = vrot.lane.b32.xlu0 %v1035_v21, %s1152_s17 }
  0xaf   :  { %1056 = vrot.lane.b32.xlu1 %v1035_v21, %s1153_s18  ;;  %1041 = vrot.lane.b32.xlu0 %v1035_v21, %s1154_s19 }
  0xb3   :  { %1066 = vrot.lane.b32.xlu1 %v1030_v18, %s1153_s18  ;;  %1051 = vrot.lane.b32.xlu0 %v1030_v18, %s1154_s19 }
  0xb7   :  { %1076 = vrot.lane.b32.xlu1 %v1035_v21, %s1155_s20  ;;  %1061 = vrot.lane.b32.xlu0 %v1035_v21, %s1156_s21 }
  0xbb   :  { %1086 = vrot.lane.b32.xlu1 %v1030_v18, %s1155_s20  ;;  %1071 = vrot.lane.b32.xlu0 %v1030_v18, %s1156_s21 }
  0xbf   :  { %352 = vrot.lane.b32.xlu1 %v1238_v19, %s1150_s15  ;;  %1081 = vrot.lane.b32.xlu0 %v1035_v21, %s1157_s22 }
  0xc3   :  { %343 = vrot.lane.b32.xlu1 %v160_v15, %s1150_s15  ;;  %1091 = vrot.lane.b32.xlu0 %v1030_v18, %s1157_s22 }
  0xc7   :  { %341 = vrot.lane.b32.xlu0 %v1234_v17, %s1150_s15  ;;  %368 = vperm.xlu1 %1095, %v365_v23  }
  0xcb   :  { %339 = vrot.lane.b32.xlu0 %v1231_v14, %s1150_s15  ;;  %703 = vperm.xlu1 %1095, %v700_v24  }
  0xcf   :  { %525 = vperm.xlu0 %1096, %v522_v53  }
 0x103   :  { %v1255_v25 = vpop.permute.xlu1 %350 }
 0x109   :  { %v1257_v27 = vpop.permute.xlu1 %996  ;;  %v992_v28 = vpop.permute.xlu0 %991 }
 0x10a   :  { %v994_v41 = vunpack.i.h.bf16 %v992_v28  ;;  %v993_v42 = vunpack.i.l.bf16 %v992_v28  ;;  %v999_v20 = vunpack.i.h.bf16 %v1257_v27  ;;  %v998_v26 = vunpack.i.l.bf16 %v1257_v27 }
 0x10d   :  { %v1261_v30 = vpop.permute.xlu1 %1006  ;;  %v1263_v31 = vpop.permute.xlu0 %1001 }
 0x10e   :  { %v1004_v28 = vunpack.i.h.bf16 %v1263_v31  ;;  %v1003_v35 = vunpack.i.l.bf16 %v1263_v31  ;;  %v1009_v58 = vunpack.i.h.bf16 %v1261_v30 }
 0x111   :  { %v1266_v33 = vpop.permute.xlu1 %1016  ;;  %v1268_v34 = vpop.permute.xlu0 %1011 }
 0x112   :  { %v1014_v39 = vunpack.i.h.bf16 %v1268_v34 }
 0x115   :  { %v1032_v37 = vpop.permute.xlu1 %1031  ;;  %v1271_v38 = vpop.permute.xlu0 %1021 }
 0x116   :  { %v1034_v43 = vunpack.i.h.bf16 %v1032_v37  ;;  %v1033_v61 = vunpack.i.l.bf16 %v1032_v37 }
 0x118   :  { %v173_v46 = vsel %vm171_vm5, %v1034_v43, %v993_v42  ;;  %v172_v48 = vsel %vm171_vm5, %v994_v41, %v1034_v43 }
 0x119   :  { %v1037_v49 = vpop.permute.xlu1 %1036  ;;  %v1294_v50 = vpop.permute.xlu0 %354  ;;  %v926_v51 = vpack.c.bf16 %v173_v46, %v1234_v17  ;;  %v929_v52 = vpack.c.bf16 %v172_v48, %v1231_v14 }
 0x11a   :  { %v1039_v63 = vunpack.i.h.bf16 %v1037_v49  ;;  %v1038_v3 = vunpack.i.l.bf16 %v1037_v49 }
 0x11b   :  { %928 = vmatprep.subr.msk.bf16.mxu0 %vm1289_vm8, %v926_v51 }
 0x11c   :  { %931 = vmatpush1.bf16.msk.msra.mxu0 %vm1301_vm9, %v929_v52  ;;  %v207_v17 = vsel %vm195_vm12, %v1038_v3, %v1039_v63 }
 0x11d   :  { %v1047_v56 = vpop.permute.xlu1 %1046  ;;  %v1027_v57 = vpop.permute.xlu0 %1026 }
 0x11e   :  { %v1029_v59 = vunpack.i.h.bf16 %v1027_v57  ;;  %v1028_v60 = vunpack.i.l.bf16 %v1027_v57  ;;  %v1049_v15 = vunpack.i.h.bf16 %v1047_v56  ;;  %v1048_v18 = vunpack.i.l.bf16 %v1047_v56 }
 0x120   :  { %v186_v4 = vsel %vm171_vm5, %v1028_v60, %v1029_v59  ;;  %v185_v10 = vsel %vm171_vm5, %v1033_v61, %v1028_v60  ;;  %v196_v40 = vsel %vm195_vm12, %v999_v20, %v1049_v15  ;;  %vm1366_vm5 = vcmp.ne.s32.totalorder %v92_v36, 15 }
 0x121   :  { %v1325_v6 = vpop.permute.xlu1 %1056  ;;  %v1042_v7 = vpop.permute.xlu0 %1041  ;;  %v950_v9 = vpack.c.bf16 %v186_v4, %v1238_v19  ;;  %v953_v16 = vpack.c.bf16 %v185_v10, %v1227_v13  ;;  %v197_v27 = vsel %vm195_vm12, %v1049_v15, %v998_v26  ;;  %v206_v42 = vsel %vm195_vm12, %v1048_v18, %v1038_v3  ;;  %vm936_vm10 = vmpackc.low %vm1280_vm6, %vm1366_vm5 }
 0x122   :  { %v1044_v11 = vunpack.i.h.bf16 %v1042_v7  ;;  %v1043_v12 = vunpack.i.l.bf16 %v1042_v7  ;;  %v1059_v31 = vunpack.i.h.bf16 %v1325_v6  ;;  %v1058_v45 = vunpack.i.l.bf16 %v1325_v6 }
 0x123   :  { %952 = vmatprep.subr.msk.bf16.mxu1 %vm1321_vm13, %v950_v9  ;;  %vm253_vm12 = vcmask 908288   ;;  %vm1545_vm6 = vmmov 1   ;;  %v1008_v61 = vunpack.i.l.bf16 %v1261_v30  ;;  %v1013_v3 = vunpack.i.l.bf16 %v1268_v34 }
 0x124   :  { %v240_v19 = vsel %vm228_vm14, %v1043_v12, %v1044_v11  ;;  %955 = vmatpush1.bf16.msk.msra.mxu1 %vm1336_vm0, %v953_v16  ;;  %v265_v59 = vsel %vm253_vm12, %v1058_v45, %v1059_v31  ;;  %v1019_v26 = vunpack.i.h.bf16 %v1266_v33  ;;  %v1023_v31 = vunpack.i.l.bf16 %v1271_v38 }
 0x125   :  { %v956_v22 = vpack.c.bf16 %v240_v19, %v207_v17  ;;  %v1067_v13 = vpop.permute.xlu1 %1066  ;;  %v1052_v23 = vpop.permute.xlu0 %1051  ;;  %v690_v30 = vcombine.high %v1221_v1, %v1221_v1 }
 0x126   :  { %v1054_v32 = vunpack.i.h.bf16 %v1052_v23  ;;  %v1053_v37 = vunpack.i.l.bf16 %v1052_v23  ;;  %v1069_v54 = vunpack.i.h.bf16 %v1067_v13  ;;  %v1068_v57 = vunpack.i.l.bf16 %v1067_v13 }
 0x127   :  { %958 = vmatprep.subr.msk.bf16.mxu1 %vm957_vm1, %v956_v22  ;;  %vm960_vm1 = vmpackc.low %vm1313_vm11, %vm1356_vm3 }
 0x128   :  { %v229_v43 = vsel %vm228_vm14, %v1004_v28, %v1054_v32  ;;  %v230_v29 = vsel %vm228_vm14, %v1054_v32, %v1003_v35  ;;  %v239_v36 = vsel %vm228_vm14, %v1053_v37, %v1043_v12  ;;  %vm1544_vm14 = vmpackc.low %vm1273_vm4, %vm1350_vm2  ;;  %v254_v4 = vsel %vm253_vm12, %v1009_v58, %v1069_v54 }
 0x129   :  { %v935_v46 = vpack.c.bf16 %v229_v43, %v196_v40  ;;  %v1381_v48 = vpop.permute.xlu1 %1076  ;;  %v1062_v49 = vpop.permute.xlu0 %1061  ;;  %v932_v51 = vpack.c.bf16 %v230_v29, %v197_v27  ;;  %v959_v52 = vpack.c.bf16 %v239_v36, %v206_v42  ;;  %vm963_vm11 = vmpackc.low %vm1327_vm15, %vm1545_vm6  ;;  %v255_v9 = vsel %vm253_vm12, %v1069_v54, %v1008_v61 }
 0x12a   :  { %v1064_v55 = vunpack.i.h.bf16 %v1062_v49  ;;  %v1063_v56 = vunpack.i.l.bf16 %v1062_v49  ;;  %v264_v10 = vsel %vm253_vm12, %v1068_v57, %v1058_v45  ;;  %v1079_v11 = vunpack.i.h.bf16 %v1381_v48  ;;  %vm1413_vm4 = vmpackc.low %vm1350_vm2, %vm1545_vm6 }
 0x12b   :  { %934 = vmatprep.subr.msk.bf16.mxu0 %vm1544_vm14, %v932_v51  ;;  %961 = vmatpush1.bf16.msk.msra.mxu1 %vm960_vm1, %v959_v52  ;;  %v1078_v34 = vunpack.i.l.bf16 %v1381_v48  ;;  %vm299_vm1 = vcmask 785408   ;;  %vm324_vm12 = vcmask 777216   ;;  %vm942_vm14 = vmpackc.low %vm1366_vm5, %vm1545_vm6  ;;  %v1018_v32 = vunpack.i.l.bf16 %v1266_v33 }
 0x12c   :  { %v286_v60 = vsel %vm274_vm7, %v1063_v56, %v1064_v55  ;;  %937 = vmatpush1.bf16.msk.msra.mxu0 %vm936_vm10, %v935_v46  ;;  %vm966_vm10 = vmpackc.low %vm1356_vm3, %vm1545_vm6  ;;  %v1024_v37 = vunpack.i.h.bf16 %v1271_v38 }
 0x12d   :  { %v1072_v44 = vpop.permute.xlu0 %1071  ;;  %v962_v62 = vpack.c.bf16 %v286_v60, %v265_v59  ;;  %v1087_v6 = vpop.permute.xlu1 %1086  ;;  %v311_v35 = vsel %vm299_vm1, %v1078_v34, %v1079_v11 }
 0x12e   :  { %v1074_v63 = vunpack.i.h.bf16 %v1072_v44  ;;  %v1073_v7 = vunpack.i.l.bf16 %v1072_v44  ;;  %v1089_v22 = vunpack.i.h.bf16 %v1087_v6  ;;  %v1088_v28 = vunpack.i.l.bf16 %v1087_v6 }
 0x12f   :  { %964 = vmatprep.subr.msk.bf16.mxu1 %vm963_vm11, %v962_v62 }
 0x130   :  { %v275_v12 = vsel %vm274_vm7, %v1014_v39, %v1074_v63  ;;  %v276_v15 = vsel %vm274_vm7, %v1074_v63, %v1013_v3  ;;  %v285_v16 = vsel %vm274_vm7, %v1073_v7, %v1063_v56  ;;  %v300_v36 = vsel %vm299_vm1, %v1019_v26, %v1089_v22  ;;  %v521_v3 = vld [vmem:[%s1513_s3] sm:$0xf] }
 0x131   :  { %v941_v17 = vpack.c.bf16 %v275_v12, %v254_v4  ;;  %v1082_v18 = vpop.permute.xlu0 %1081  ;;  %v938_v19 = vpack.c.bf16 %v276_v15, %v255_v9  ;;  %v965_v20 = vpack.c.bf16 %v285_v16, %v264_v10  ;;  %v353_v40 = vpop.permute.xlu1 %352  ;;  %v301_v46 = vsel %vm299_vm1, %v1089_v22, %v1018_v32 }
 0x132   :  { %v1084_v13 = vunpack.i.h.bf16 %v1082_v18  ;;  %v1083_v23 = vunpack.i.l.bf16 %v1082_v18  ;;  %vm345_vm7 = vcmask 769024   ;;  %v310_v33 = vsel %vm299_vm1, %v1088_v28, %v1078_v34 }
 0x133   :  { %940 = vmatprep.subr.msk.bf16.mxu0 %vm1413_vm4, %v938_v19  ;;  %967 = vmatpush1.bf16.msk.msra.mxu1 %vm966_vm10, %v965_v20  ;;  %v357_v56 = vsel %vm345_vm7, %v353_v40, %v1294_v50  ;;  %v356_v50 = vsel %vm345_vm7, %v1255_v25, %v353_v40  ;;  %v693_v9 = vcombine.high %v1223_v2, %v1223_v2 }
 0x134   :  { %v336_v27 = vsel %vm324_vm12, %v1083_v23, %v1084_v13  ;;  %943 = vmatpush1.bf16.msk.msra.mxu0 %vm942_vm14, %v941_v17 }
 0x135   :  { %v1092_v42 = vpop.permute.xlu0 %1091  ;;  %v968_v43 = vpack.c.bf16 %v336_v27, %v311_v35  ;;  %v344_v57 = vpop.permute.xlu1 %343 }
 0x136   :  { %v1094_v45 = vunpack.i.h.bf16 %v1092_v42  ;;  %v1093_v29 = vunpack.i.l.bf16 %v1092_v42 }
 0x137   :  { %970 = vmatprep.subr.msk.bf16.mxu1 %vm1321_vm13, %v968_v43  ;;  %vm528_vm13 = vcmask 31744  }
 0x138   :  { %v325_v48 = vsel %vm324_vm12, %v1024_v37, %v1094_v45  ;;  %v326_v49 = vsel %vm324_vm12, %v1094_v45, %v1023_v31  ;;  %v335_v51 = vsel %vm324_vm12, %v1093_v29, %v1083_v23 }
 0x139   :  { %v944_v38 = vpack.c.bf16 %v326_v49, %v301_v46  ;;  %v947_v52 = vpack.c.bf16 %v325_v48, %v300_v36  ;;  %v971_v54 = vpack.c.bf16 %v335_v51, %v310_v33  ;;  %v342_v55 = vpop.permute.xlu0 %341 }
 0x13a   :  { %v347_v58 = vsel %vm345_vm7, %v342_v55, %v344_v57 }
 0x13b   :  { %946 = vmatprep.subr.msk.bf16.mxu0 %vm1289_vm8, %v944_v38  ;;  %973 = vmatpush1.bf16.msk.msra.mxu1 %vm1336_vm0, %v971_v54  ;;  %vm371_vm8 = vcmask 588800  }
 0x13c   :  { %949 = vmatpush1.bf16.msk.msra.mxu0 %vm1301_vm9, %v947_v52  ;;  %911 = vmatprep.subr.msk.mxu1 %vm1327_vm15, %v357_v56  ;;  %vm532_vm9 = vcmask 1043456  }
 0x13d   :  { %v340_v5 = vpop.permute.xlu0 %339  ;;  %898 = vmatprep.subr.msk.mxu0 %vm1350_vm2, %v347_v58 }
 0x13e   :  { %v346_v14 = vsel %vm345_vm7, %v340_v5, %v342_v55 }
 0x13f   :  { %912 = vmatpush1.msk.msra.mxu1 %vm1356_vm3, %v356_v50 }
 0x140   :  { %899 = vmatpush1.msk.msra.mxu0 %vm1366_vm5, %v346_v14  ;;  %913 = vmatmul.mubr.msk.f32.vlgmr.msra.gmra.mrb[0].mxu1 %vm371_vm8, %v364_v47 }
 0x141   :  { %900 = vmatmul.mubr.msk.f32.vlgmr.msra.gmra.mrb[0].mxu0 %vm371_vm8, %v364_v47  ;;  %680 = vmatprep.mubr.f32.mxu1 %v1148_v0 }
 0x142   :  { %609 = vmatprep.mubr.f32.mxu0 %v1148_v0 }
 0x146   :  { %v369_v25 = vpop.permute.xlu1 %368 }
 0x14e   :  { %v526_v6 = vpop.permute.xlu0 %525 }
 0x213   :  { %v512_v8 = vpop.f32.mrb[0].mxu1 }
 0x214   :  { %v513_v21 = vadd.f32 %v512_v8, %v369_v25  ;;  %v441_v59 = vpop.f32.mrb[0].mxu0  ;;  %v514_v24 = vpop.f32.mrb[1].mxu1 }
 0x215   :  { %v442_v60 = vadd.f32 %v441_v59, %v369_v25  ;;  %v515_v44 = vadd.f32 %v514_v24, %v369_v25  ;;  %v443_v41 = vpop.f32.mrb[1].mxu0 }
 0x216   :  { %v444_v61 = vadd.f32 %v443_v41, %v369_v25  ;;  %v519_v62 = vmax.f32 %v513_v21, 0.0 }
 0x217   :  { %v520_v39 = vmax.f32 %v515_v44, 0.0  ;;  %v517_v4 = vmax.f32 %v442_v60, 0.0 }
 0x218   :  { %v518_v63 = vmax.f32 %v444_v61, 0.0 }
 0x219   :  { %917 = vmatprep.subr.msk.mxu1 %vm532_vm9, %v520_v39 }
 0x21a   :  { %914 = vmatprep.subr.msk.mxu0 %vm532_vm9, %v518_v63  ;;  %918 = vmatpush1.msk.msra.mxu1 %vm532_vm9, %v519_v62 }
 0x21b   :  { %915 = vmatpush1.msk.msra.mxu0 %vm532_vm9, %v517_v4  ;;  %919 = vmatmul.mubr.msk.f32.vlgmr.msra.gmra.mrb[2].mxu1 %vm528_vm13, %v521_v3 }
 0x21c   :  { %916 = vmatmul.mubr.msk.f32.vlgmr.msra.gmra.mrb[2].mxu0 %vm528_vm13, %v521_v3  ;;  %856 = vmatprep.mubr.f32.mxu1 %v1148_v0 }
 0x21d   :  { %785 = vmatprep.mubr.f32.mxu0 %v1148_v0  ;;  %v699_v0 = vld [vmem:[%s1515_s5] sm:$0xf]  ;;  %s1160_s5 = smov [#allocation6]  }
 0x21e   :  { %s879_s30 = sshll.u32 %s1160_s5, 4  ;;  %s880_s30 = int_to_ptr.vmem [resolvable:$true] %s879_s30 }
 0x21f   :  { %s1119_s8 = scalar_lea.vmem %s880_s30, 256  ;;  %p1124_p9 = scmp.lt.s32.totalorder %s880_s30, %s880_s30 }
 0x220   :  { %p1120_p8 = scmp.ne.s32.totalorder %s880_s30, %s1119_s8  ;;  %p1125_p10 = scmp.lt.s32.totalorder %s1119_s8, %s1119_s8 }
 0x222   :  { %p1126_p11 = por %p1125_p10, %p1124_p9 }
 0x224   :  { %p1127_p12 = pnand %p1126_p11, %p1120_p8 }
 0x2ee   :  { %v682_v7 = vpop.f32.mrb[2].mxu1 }
 0x2ef   :  { %v683_v10 = vadd.f32 %v682_v7, %v526_v6  ;;  %v611_v11 = vpop.f32.mrb[2].mxu0  ;;  %v684_v12 = vpop.f32.mrb[3].mxu1 }
 0x2f0   :  { %v612_v34 = vadd.f32 %v611_v11, %v526_v6  ;;  %v685_v15 = vadd.f32 %v684_v12, %v526_v6  ;;  %v613_v16 = vpop.f32.mrb[3].mxu0 }
 0x2f1   :  { %v614_v17 = vadd.f32 %v613_v16, %v526_v6  ;;  %v697_v19 = vadd.f32 %v683_v10, %v1223_v2  ;;  %v704_v2 = vpop.permute.xlu1 %703 }
 0x2f2   :  { %v698_v18 = vadd.f32 %v693_v9, %v685_v15  ;;  %v695_v22 = vadd.f32 %v612_v34, %v1221_v1 }
 0x2f3   :  { %v696_v20 = vadd.f32 %v690_v30, %v614_v17 }
 0x2f4   :  { %923 = vmatprep.subr.msk.mxu1 %vm532_vm9, %v698_v18 }
 0x2f5   :  { %920 = vmatprep.subr.msk.mxu0 %vm532_vm9, %v696_v20  ;;  %924 = vmatpush1.msk.msra.mxu1 %vm532_vm9, %v697_v19 }
 0x2f6   :  { %921 = vmatpush1.msk.msra.mxu0 %vm532_vm9, %v695_v22  ;;  %925 = vmatmul.mubr.msk.f32.vlgmr.msra.gmra.mrb[4].mxu1 %vm528_vm13, %v699_v0 }
 0x2f7   :  { %922 = vmatmul.mubr.msk.f32.vlgmr.msra.gmra.mrb[4].mxu0 %vm528_vm13, %v699_v0 }
 0x3c9   :  { %v858_v13 = vpop.f32.mrb[4].mxu1 }
 0x3ca   :  { %v859_v23 = vadd.f32 %v858_v13, %v704_v2  ;;  %v787_v26 = vpop.f32.mrb[4].mxu0  ;;  %v860_v28 = vpop.f32.mrb[5].mxu1 }
 0x3cb   :  { %v788_v32 = vadd.f32 %v787_v26, %v704_v2  ;;  %v861_v37 = vadd.f32 %v860_v28, %v704_v2  ;;  %v789_v1 = vpop.f32.mrb[5].mxu0 }
 0x3cc   :  { %v865_v35 = vrot.slane %v859_v23, 4  ;;  %v790_v40 = vadd.f32 %v789_v1, %v704_v2 }
 0x3cd   :  { %v866_v27 = vrot.slane %v861_v37, 4 }
 0x3ce   :  { %v869_v42 = vsel %vm532_vm9, %v788_v32, %v865_v35 }
 0x3cf   :  { %v870_v31 = vsel %vm532_vm9, %v790_v40, %v866_v27  ;;  %871 = vst [vmem:[#allocation6] sm:$0xff] %v869_v42 }
 0x3d0   :  { %872 = vst [vmem:[#allocation6 + $0x8] sm:$0xff] %v870_v31 }
 0x3d1   :  { %1130 = shalt.err (!%p1127_p12)
}
 0x3d2   :  { %s1131_s11 = scalar_lea.hbm %s1517_s7, 256 }
 0x3d3   :  { %p1132_p13 = scmp.ne.s32.totalorder %s1517_s7, %s1131_s11  ;;  %p1135_p0 = scmp.lt.u32.totalorder %s1131_s11, %s1517_s7 }
 0x3d5   :  { %p1137_p1 = pnand %p1135_p0, %p1132_p13 }
 0x3d7   :  { %1140 = shalt.err (!%p1137_p1)
}
 0x3d8   :  { %882 = dma.vmem_to_hbm [thread:$0]  %s880_s30, 256, %s1517_s7, [#allocation5]  }
 0x3d9   :  { %1143 = dma.done.wait [#allocation5], 256  }
 0x3da   :  { %1144 = vsyncadd [#allocation5], 4294967040 }
 0x3db   :  { %886 = vsyncpa [#allocation4], 1 }
 0x3dc   :  { %887 = vsyncpa [#allocation5], 1 }

</bundles_post_ra>
